<compile_context>
chip_gen: v5e
topology: v5e:2x2
jax: 0.10.0
libtpu: 0.0.40
codegen_flags: <defaults>
</compile_context>

<pallas_src>
import jax
import jax.numpy as jnp
from jax.experimental import pallas as pl
from jax.experimental.pallas import tpu as pltpu

# Edge index order used for the stacked parameter tensors.
EDGES = [(0, 1), (0, 2), (0, 3), (1, 2), (1, 3), (2, 3)]
E01, E02, E03, E12, E13, E23 = range(6)

_LANES = 128
# Safe across generations: v5e/v6e have 128 MiB physical VMEM, v7x has 64 MiB
# per TensorCore -> 48 MiB leaves headroom everywhere.
_VMEM_LIMIT_BYTES = 48 * 1024 * 1024

# TODO(synk): drop_path (stochastic depth, only active when learnt_op=True),
# MixedOperation soft-selection, PREPROC_X / PREPROC_X2 and the
# FactorizedReduce fallback branch are not exercised by this instantiation and
# are intentionally not implemented.


def _dag_kernel(x_ref, wa_ref, wb_ref, wc_ref, sa_ref, sb_ref, sc_ref, o_ref):
    """One (C, TT) channel-major token tile: run the whole 6-edge DAG on-chip.

      x_ref : (C, TT)  tile (one batch element, TT spatial positions on lanes)
      wa_ref: (3C, C)  bf16  [w01; w02; w03], BN scale folded into rows
      wb_ref: (2C, C)  bf16  [w12; w13],      BN scale folded into rows
      wc_ref: (C,  C)  bf16   w23,            BN scale folded into rows
      sa/sb/sc: (3C,1)/(2C,1)/(C,1) f32 BN shifts (broadcast over lanes)
      o_ref : (C, TT)  output tile
    """
    C = wc_ref.shape[0]
    x = x_ref[...].astype(jnp.float32)

    def fused_edges(inp_f32, w_ref, s_ref):
        # ReLU (VPU, f32) -> fused 1x1 convs as ONE wide matmul (MXU, bf16 in /
        # f32 acc) -> BN shift (scale already folded into the weights).
        h = jnp.maximum(inp_f32, 0.0).astype(jnp.bfloat16)
        y = jnp.dot(w_ref[...], h, preferred_element_type=jnp.float32)
        return y + s_ref[...]

    # TODO(synk): if a compute-bound config shows MXU bubbles (large C), split
    # the tile into two lane halves and interleave the two DAG chains so the
    # matmuls of one half overlap the VPU epilogue of the other.
    ya = fused_edges(x, wa_ref, sa_ref)          # rows: [h01 | h02 | h03]
    acc = x + ya[2 * C:3 * C]                    # residual x + h03
    in1 = ya[0:C]                                # node-1 input = h01

    yb = fused_edges(in1, wb_ref, sb_ref)        # rows: [h12 | h13]
    in2 = ya[C:2 * C] + yb[0:C]                  # node-2 input = h02 + h12
    acc = acc + yb[C:2 * C]                      # + h13

    h23 = fused_edges(in2, wc_ref, sc_ref)       # node-2 -> node-3 edge
    o_ref[...] = (acc + h23).astype(o_ref.dtype)


def hierarchical_operation_forward(x_nchw, w_oi, bn_scale, bn_shift, *,
                                   tile_t=1024, out_dtype=None):
    """x_nchw: (N, C, H, W), f32 or bf16.  w_oi: (6, Cout, Cin) 1x1 conv weights.
    bn_scale/bn_shift: (6, C) folded eval-mode BatchNorm params.
    Returns (N, C, H, W) in out_dtype (defaults to x dtype)."""
    N, C, H, W = x_nchw.shape
    T = H * W
    if C % 8 != 0:
        # Keeps the sublane slices of the fused matmul output tile-aligned
        # (misaligned slices would materialize (C, tT) VMEM copies).
        raise ValueError(f"channels_in must be a multiple of 8, got {C}")
    out_dtype = x_nchw.dtype if out_dtype is None else jnp.dtype(out_dtype)

    # Fold BN scale into the conv weights (exact: scale is per output channel),
    # stack edges that share an input along Cout, and store weights as bf16.
    w_folded = w_oi.astype(jnp.float32) * bn_scale[:, :, None]              # (6, Cout, Cin)
    w_a = jnp.concatenate([w_folded[E01], w_folded[E02], w_folded[E03]],
                          axis=0).astype(jnp.bfloat16)                      # (3C, C)
    w_b = jnp.concatenate([w_folded[E12], w_folded[E13]],
                          axis=0).astype(jnp.bfloat16)                      # (2C, C)
    w_c = w_folded[E23].astype(jnp.bfloat16)                                # (C, C)
    s_a = jnp.concatenate([bn_shift[E01], bn_shift[E02], bn_shift[E03]],
                          axis=0)[:, None].astype(jnp.float32)              # (3C, 1)
    s_b = jnp.concatenate([bn_shift[E12], bn_shift[E13]],
                          axis=0)[:, None].astype(jnp.float32)              # (2C, 1)
    s_c = bn_shift[E23][:, None].astype(jnp.float32)                        # (C, 1)

    # Channel-major tokens: NCHW reshapes directly (no transpose / extra HBM
    # pass) into (N, C, H*W) with the spatial axis on lanes.
    x_tok = x_nchw.reshape(N, C, T)

    # Token tile: lane-aligned, VMEM-budget clamped, sized to tile T with the
    # minimum ragged remainder (<= 127 lanes, handled by masked stores --
    # no wrapper-side pad or slice, no extra HBM passes).
    # Live VMEM per grid step ~ 60 * C * tT bytes (double-buffered f32 x/out
    # plus ~11 (C,tT) f32 intermediates).
    budget_tt = int((_VMEM_LIMIT_BYTES * 0.7) // (60 * C))
    budget_tt = max(_LANES, (budget_tt // _LANES) * _LANES)
    tile_t = max(_LANES, (int(tile_t) // _LANES) * _LANES)
    cap = min(tile_t, budget_tt)
    n_t = int(pl.cdiv(T, cap))
    tT = int(pl.cdiv(int(pl.cdiv(T, n_t)), _LANES)) * _LANES
    grid = (N, int(pl.cdiv(T, tT)))

    const = lambda n, t: (0, 0)

    ce = pl.CostEstimate(
        flops=2 * 6 * C * C * T * N,
        transcendentals=0,
        bytes_accessed=(N * C * T * (x_nchw.dtype.itemsize + out_dtype.itemsize)
                        + 6 * C * C * 2 + 6 * C * 4),
    )

    def _call(single_buffer_consts):
        # Grid-invariant operands: single-buffer them (double-buffering a
        # constant block is pure VMEM waste).
        if single_buffer_consts:
            cspec = lambda shape: pl.BlockSpec(shape, const,
                                               pipeline_mode=pl.Buffered(1))
        else:
            cspec = lambda shape: pl.BlockSpec(shape, const)
        return pl.pallas_call(
            _dag_kernel,
            out_shape=jax.ShapeDtypeStruct((N, C, T), out_dtype),
            grid_spec=pltpu.PrefetchScalarGridSpec(
                num_scalar_prefetch=0,
                grid=grid,
                in_specs=[
                    pl.BlockSpec((None, C, tT), lambda n, t: (n, 0, t)),  # x tile
                    cspec((3 * C, C)),                                    # w_a
                    cspec((2 * C, C)),                                    # w_b
                    cspec((C, C)),                                        # w_c
                    cspec((3 * C, 1)),                                    # s_a
                    cspec((2 * C, 1)),                                    # s_b
                    cspec((C, 1)),                                        # s_c
                ],
                out_specs=pl.BlockSpec((None, C, tT), lambda n, t: (n, 0, t)),
            ),
            compiler_params=pltpu.CompilerParams(
                # TODO(synk): on v7x, consider pltpu.CORE_PARALLEL on the token
                # axis if a trace shows the grid is not sharded across both TCs.
                dimension_semantics=("parallel", "parallel"),
                vmem_limit_bytes=_VMEM_LIMIT_BYTES,
            ),
            cost_estimate=ce,
        )(x_tok, w_a, w_b, w_c, s_a, s_b, s_c)

    try:
        out_tok = _call(True)
    except Exception:
        # pipeline_mode=pl.Buffered(1) not supported by this jax build ->
        # fall back to default double-buffering (identical results).
        out_tok = _call(False)

    return out_tok.reshape(N, C, H, W)


def _reference_forward(x_nchw, w_oi, bn_scale, bn_shift):
    """Pure-JAX f32 reference replicating the PyTorch DAG semantics (NCHW)."""
    N, C, H, W = x_nchw.shape
    x_t = jnp.transpose(x_nchw, (0, 2, 3, 1)).reshape(-1, C)   # (M, Cin)

    def edge(inp, e):
        h = jnp.maximum(inp, 0.0)
        return (h @ w_oi[e].T) * bn_scale[e] + bn_shift[e]

    h01 = edge(x_t, E01)
    h02 = edge(x_t, E02)
    h03 = edge(x_t, E03)
    in1 = h01
    h12 = edge(in1, E12)
    h13 = edge(in1, E13)
    in2 = h02 + h12
    h23 = edge(in2, E23)
    out = h03 + h13 + h23 + x_t
    return jnp.transpose(out.reshape(N, H, W, C), (0, 3, 1, 2))


if __name__ == "__main__":
    key = jax.random.PRNGKey(0)
    N, C, H, W = 2, 8, 16, 16                     # small NCHW input

    k_x, k_w, k_mean, k_var = jax.random.split(key, 4)

    x = jax.random.normal(k_x, (N, C, H, W), dtype=jnp.float32)

    # 1x1 conv weights per edge: PyTorch shape (Cout, Cin, 1, 1), no bias.
    w_pt = jax.random.normal(k_w, (6, C, C, 1, 1), dtype=jnp.float32) * 0.1
    w_oi = w_pt[..., 0, 0]                                    # (6, Cout, Cin)

    # BatchNorm (eval mode, affine=False): gamma=1, beta=0, running stats
    # folded into per-channel scale/shift.
    eps = 1e-5
    running_mean = 0.1 * jax.random.normal(k_mean, (6, C), dtype=jnp.float32)
    running_var = 0.5 + jax.random.uniform(k_var, (6, C), dtype=jnp.float32)
    bn_scale = 1.0 / jnp.sqrt(running_var + eps)              # gamma = 1
    bn_shift = -running_mean * bn_scale                       # beta = 0

    out = hierarchical_operation_forward(x, w_oi, bn_scale, bn_shift)
    out = jax.block_until_ready(out)

    ref = _reference_forward(x, w_oi, bn_scale, bn_shift)
    assert out.shape == (N, C, H, W)
    # bf16 MXU operands (f32 accumulation) vs f32 reference -> loosened tol.
    assert jnp.allclose(out, ref, atol=3e-2, rtol=3e-2), "mismatch vs reference"

    print("KERNEL_OK")
</pallas_src>

<mosaic_0001>
module attributes {stable_mosaic.version = 11 : i64} {
  func.func @_dag_kernel(%arg0: i32, %arg1: i32, %arg2: memref<1x8x256xf32, #tpu.memory_space<vmem>>, %arg3: memref<24x8xbf16, #tpu.memory_space<vmem>>, %arg4: memref<16x8xbf16, #tpu.memory_space<vmem>>, %arg5: memref<8x8xbf16, #tpu.memory_space<vmem>>, %arg6: memref<24x1xf32, #tpu.memory_space<vmem>>, %arg7: memref<16x1xf32, #tpu.memory_space<vmem>>, %arg8: memref<8x1xf32, #tpu.memory_space<vmem>>, %arg9: memref<1x8x256xf32, #tpu.memory_space<vmem>>) attributes {dimension_semantics = [#tpu.dimension_semantics<parallel>, #tpu.dimension_semantics<parallel>], iteration_bounds = array<i64: 2, 1>, scalar_prefetch = 0 : i64, scratch_operands = 0 : i64, tpu.core_type = #tpu.core_type<tc>, window_params = [{transform_indices = @transform_0, window_bounds = array<i64: 1, 8, 256>}, {pipeline_mode = #tpu.pipeline_mode<synchronous>, transform_indices = @transform_1, window_bounds = array<i64: 24, 8>}, {pipeline_mode = #tpu.pipeline_mode<synchronous>, transform_indices = @transform_2, window_bounds = array<i64: 16, 8>}, {pipeline_mode = #tpu.pipeline_mode<synchronous>, transform_indices = @transform_3, window_bounds = array<i64: 8, 8>}, {pipeline_mode = #tpu.pipeline_mode<synchronous>, transform_indices = @transform_4, window_bounds = array<i64: 24, 1>}, {pipeline_mode = #tpu.pipeline_mode<synchronous>, transform_indices = @transform_5, window_bounds = array<i64: 16, 1>}, {pipeline_mode = #tpu.pipeline_mode<synchronous>, transform_indices = @transform_6, window_bounds = array<i64: 8, 1>}, {transform_indices = @transform_7, window_bounds = array<i64: 1, 8, 256>}]} {
    %c0 = arith.constant 0 : index
    %c0_0 = arith.constant 0 : index
    %c0_1 = arith.constant 0 : index
    %0 = vector.load %arg2[%c0, %c0_0, %c0_1] : memref<1x8x256xf32, #tpu.memory_space<vmem>>, vector<1x8x256xf32>
    %1 = vector.shape_cast %0 : vector<1x8x256xf32> to vector<8x256xf32>
    %cst = arith.constant 0.000000e+00 : f32
    %2 = vector.broadcast %cst : f32 to vector<8x256xf32>
    %3 = arith.maximumf %1, %2 : vector<8x256xf32>
    %4 = arith.truncf %3 : vector<8x256xf32> to vector<8x256xbf16>
    %c0_2 = arith.constant 0 : index
    %c0_3 = arith.constant 0 : index
    %5 = vector.load %arg3[%c0_2, %c0_3] : memref<24x8xbf16, #tpu.memory_space<vmem>>, vector<24x8xbf16>
    %cst_4 = arith.constant dense<0.000000e+00> : vector<24x256xf32>
    %6 = tpu.matmul %5, %4, %cst_4 {dimension_numbers = #tpu.dot_dimension_numbers<[1], [0], [0], [1], [0, 0, 1, 1], [], []>} : vector<24x8xbf16>, vector<8x256xbf16>, vector<24x256xf32> -> vector<24x256xf32>
    %c0_5 = arith.constant 0 : index
    %c0_6 = arith.constant 0 : index
    %7 = vector.load %arg6[%c0_5, %c0_6] : memref<24x1xf32, #tpu.memory_space<vmem>>, vector<24x1xf32>
    %8 = vector.broadcast %7 : vector<24x1xf32> to vector<24x256xf32>
    %9 = arith.addf %6, %8 : vector<24x256xf32>
    %10 = vector.extract_strided_slice %9 {offsets = [16, 0], sizes = [8, 256], strides = [1, 1]} : vector<24x256xf32> to vector<8x256xf32>
    %11 = arith.addf %1, %10 : vector<8x256xf32>
    %12 = vector.extract_strided_slice %9 {offsets = [0, 0], sizes = [8, 256], strides = [1, 1]} : vector<24x256xf32> to vector<8x256xf32>
    %cst_7 = arith.constant 0.000000e+00 : f32
    %13 = vector.broadcast %cst_7 : f32 to vector<8x256xf32>
    %14 = arith.maximumf %12, %13 : vector<8x256xf32>
    %15 = arith.truncf %14 : vector<8x256xf32> to vector<8x256xbf16>
    %c0_8 = arith.constant 0 : index
    %c0_9 = arith.constant 0 : index
    %16 = vector.load %arg4[%c0_8, %c0_9] : memref<16x8xbf16, #tpu.memory_space<vmem>>, vector<16x8xbf16>
    %cst_10 = arith.constant dense<0.000000e+00> : vector<16x256xf32>
    %17 = tpu.matmul %16, %15, %cst_10 {dimension_numbers = #tpu.dot_dimension_numbers<[1], [0], [0], [1], [0, 0, 1, 1], [], []>} : vector<16x8xbf16>, vector<8x256xbf16>, vector<16x256xf32> -> vector<16x256xf32>
    %c0_11 = arith.constant 0 : index
    %c0_12 = arith.constant 0 : index
    %18 = vector.load %arg7[%c0_11, %c0_12] : memref<16x1xf32, #tpu.memory_space<vmem>>, vector<16x1xf32>
    %19 = vector.broadcast %18 : vector<16x1xf32> to vector<16x256xf32>
    %20 = arith.addf %17, %19 : vector<16x256xf32>
    %21 = vector.extract_strided_slice %9 {offsets = [8, 0], sizes = [8, 256], strides = [1, 1]} : vector<24x256xf32> to vector<8x256xf32>
    %22 = vector.extract_strided_slice %20 {offsets = [0, 0], sizes = [8, 256], strides = [1, 1]} : vector<16x256xf32> to vector<8x256xf32>
    %23 = arith.addf %21, %22 : vector<8x256xf32>
    %24 = vector.extract_strided_slice %20 {offsets = [8, 0], sizes = [8, 256], strides = [1, 1]} : vector<16x256xf32> to vector<8x256xf32>
    %25 = arith.addf %11, %24 : vector<8x256xf32>
    %cst_13 = arith.constant 0.000000e+00 : f32
    %26 = vector.broadcast %cst_13 : f32 to vector<8x256xf32>
    %27 = arith.maximumf %23, %26 : vector<8x256xf32>
    %28 = arith.truncf %27 : vector<8x256xf32> to vector<8x256xbf16>
    %c0_14 = arith.constant 0 : index
    %c0_15 = arith.constant 0 : index
    %29 = vector.load %arg5[%c0_14, %c0_15] : memref<8x8xbf16, #tpu.memory_space<vmem>>, vector<8x8xbf16>
    %cst_16 = arith.constant dense<0.000000e+00> : vector<8x256xf32>
    %30 = tpu.matmul %29, %28, %cst_16 {dimension_numbers = #tpu.dot_dimension_numbers<[1], [0], [0], [1], [0, 0, 1, 1], [], []>} : vector<8x8xbf16>, vector<8x256xbf16>, vector<8x256xf32> -> vector<8x256xf32>
    %c0_17 = arith.constant 0 : index
    %c0_18 = arith.constant 0 : index
    %31 = vector.load %arg8[%c0_17, %c0_18] : memref<8x1xf32, #tpu.memory_space<vmem>>, vector<8x1xf32>
    %32 = vector.broadcast %31 : vector<8x1xf32> to vector<8x256xf32>
    %33 = arith.addf %30, %32 : vector<8x256xf32>
    %34 = arith.addf %25, %33 : vector<8x256xf32>
    %c0_19 = arith.constant 0 : index
    %c0_20 = arith.constant 0 : index
    %c0_21 = arith.constant 0 : index
    %35 = vector.load %arg9[%c0_19, %c0_20, %c0_21] : memref<1x8x256xf32, #tpu.memory_space<vmem>>, vector<1x8x256xf32>
    %36 = vector.shape_cast %35 : vector<1x8x256xf32> to vector<8x256xf32>
    %37 = vector.shape_cast %34 : vector<8x256xf32> to vector<1x8x256xf32>
    tpu.vector_store %arg9[%c0_19, %c0_20, %c0_21], %37 {strides = array<i32>} : memref<1x8x256xf32, #tpu.memory_space<vmem>>, vector<1x8x256xf32>,
    return
  }
  func.func @transform_0(%arg0: i32, %arg1: i32) -> (i32, i32, i32) {
    %c0_i32 = arith.constant 0 : i32
    %c0_i32_0 = arith.constant 0 : i32
    return %arg0, %c0_i32, %arg1 : i32, i32, i32
  }
  func.func @transform_1(%arg0: i32, %arg1: i32) -> (i32, i32) {
    %c0_i32 = arith.constant 0 : i32
    %c0_i32_0 = arith.constant 0 : i32
    %c0_i32_1 = arith.constant 0 : i32
    return %c0_i32, %c0_i32_0 : i32, i32
  }
  func.func @transform_2(%arg0: i32, %arg1: i32) -> (i32, i32) {
    %c0_i32 = arith.constant 0 : i32
    %c0_i32_0 = arith.constant 0 : i32
    %c0_i32_1 = arith.constant 0 : i32
    return %c0_i32, %c0_i32_0 : i32, i32
  }
  func.func @transform_3(%arg0: i32, %arg1: i32) -> (i32, i32) {
    %c0_i32 = arith.constant 0 : i32
    %c0_i32_0 = arith.constant 0 : i32
    %c0_i32_1 = arith.constant 0 : i32
    return %c0_i32, %c0_i32_0 : i32, i32
  }
  func.func @transform_4(%arg0: i32, %arg1: i32) -> (i32, i32) {
    %c0_i32 = arith.constant 0 : i32
    %c0_i32_0 = arith.constant 0 : i32
    %c0_i32_1 = arith.constant 0 : i32
    return %c0_i32, %c0_i32_0 : i32, i32
  }
  func.func @transform_5(%arg0: i32, %arg1: i32) -> (i32, i32) {
    %c0_i32 = arith.constant 0 : i32
    %c0_i32_0 = arith.constant 0 : i32
    %c0_i32_1 = arith.constant 0 : i32
    return %c0_i32, %c0_i32_0 : i32, i32
  }
  func.func @transform_6(%arg0: i32, %arg1: i32) -> (i32, i32) {
    %c0_i32 = arith.constant 0 : i32
    %c0_i32_0 = arith.constant 0 : i32
    %c0_i32_1 = arith.constant 0 : i32
    return %c0_i32, %c0_i32_0 : i32, i32
  }
  func.func @transform_7(%arg0: i32, %arg1: i32) -> (i32, i32, i32) {
    %c0_i32 = arith.constant 0 : i32
    %c0_i32_0 = arith.constant 0 : i32
    return %arg0, %c0_i32, %arg1 : i32, i32, i32
  }
}

module attributes {stable_mosaic.version = 11 : i64} {
  func.func @_dag_kernel(%arg0: i32, %arg1: i32, %arg2: memref<1x8x256xf32, #tpu.memory_space<vmem>>, %arg3: memref<24x8xbf16, #tpu.memory_space<vmem>>, %arg4: memref<16x8xbf16, #tpu.memory_space<vmem>>, %arg5: memref<8x8xbf16, #tpu.memory_space<vmem>>, %arg6: memref<24x1xf32, #tpu.memory_space<vmem>>, %arg7: memref<16x1xf32, #tpu.memory_space<vmem>>, %arg8: memref<8x1xf32, #tpu.memory_space<vmem>>, %arg9: memref<1x8x256xf32, #tpu.memory_space<vmem>>) attributes {dimension_semantics = [#tpu.dimension_semantics<parallel>, #tpu.dimension_semantics<parallel>], iteration_bounds = array<i64: 2, 1>, scalar_prefetch = 0 : i64, scratch_operands = 0 : i64, tpu.core_type = #tpu.core_type<tc>, window_params = [{transform_indices = @transform_0, window_bounds = array<i64: 1, 8, 256>}, {pipeline_mode = #tpu.pipeline_mode<synchronous>, transform_indices = @transform_1, window_bounds = array<i64: 24, 8>}, {pipeline_mode = #tpu.pipeline_mode<synchronous>, transform_indices = @transform_2, window_bounds = array<i64: 16, 8>}, {pipeline_mode = #tpu.pipeline_mode<synchronous>, transform_indices = @transform_3, window_bounds = array<i64: 8, 8>}, {pipeline_mode = #tpu.pipeline_mode<synchronous>, transform_indices = @transform_4, window_bounds = array<i64: 24, 1>}, {pipeline_mode = #tpu.pipeline_mode<synchronous>, transform_indices = @transform_5, window_bounds = array<i64: 16, 1>}, {pipeline_mode = #tpu.pipeline_mode<synchronous>, transform_indices = @transform_6, window_bounds = array<i64: 8, 1>}, {transform_indices = @transform_7, window_bounds = array<i64: 1, 8, 256>}]} {
    %c0 = arith.constant 0 : index
    %c0_0 = arith.constant 0 : index
    %c0_1 = arith.constant 0 : index
    %0 = vector.load %arg2[%c0, %c0_0, %c0_1] : memref<1x8x256xf32, #tpu.memory_space<vmem>>, vector<1x8x256xf32>
    %1 = vector.shape_cast %0 : vector<1x8x256xf32> to vector<8x256xf32>
    %cst = arith.constant 0.000000e+00 : f32
    %2 = vector.broadcast %cst : f32 to vector<8x256xf32>
    %3 = arith.maximumf %1, %2 : vector<8x256xf32>
    %4 = arith.truncf %3 : vector<8x256xf32> to vector<8x256xbf16>
    %c0_2 = arith.constant 0 : index
    %c0_3 = arith.constant 0 : index
    %5 = vector.load %arg3[%c0_2, %c0_3] : memref<24x8xbf16, #tpu.memory_space<vmem>>, vector<24x8xbf16>
    %cst_4 = arith.constant dense<0.000000e+00> : vector<24x256xf32>
    %6 = tpu.matmul %5, %4, %cst_4 {dimension_numbers = #tpu.dot_dimension_numbers<[1], [0], [0], [1], [0, 0, 1, 1], [], []>} : vector<24x8xbf16>, vector<8x256xbf16>, vector<24x256xf32> -> vector<24x256xf32>
    %c0_5 = arith.constant 0 : index
    %c0_6 = arith.constant 0 : index
    %7 = vector.load %arg6[%c0_5, %c0_6] : memref<24x1xf32, #tpu.memory_space<vmem>>, vector<24x1xf32>
    %8 = vector.broadcast %7 : vector<24x1xf32> to vector<24x256xf32>
    %9 = arith.addf %6, %8 : vector<24x256xf32>
    %10 = vector.extract_strided_slice %9 {offsets = [16, 0], sizes = [8, 256], strides = [1, 1]} : vector<24x256xf32> to vector<8x256xf32>
    %11 = arith.addf %1, %10 : vector<8x256xf32>
    %12 = vector.extract_strided_slice %9 {offsets = [0, 0], sizes = [8, 256], strides = [1, 1]} : vector<24x256xf32> to vector<8x256xf32>
    %cst_7 = arith.constant 0.000000e+00 : f32
    %13 = vector.broadcast %cst_7 : f32 to vector<8x256xf32>
    %14 = arith.maximumf %12, %13 : vector<8x256xf32>
    %15 = arith.truncf %14 : vector<8x256xf32> to vector<8x256xbf16>
    %c0_8 = arith.constant 0 : index
    %c0_9 = arith.constant 0 : index
    %16 = vector.load %arg4[%c0_8, %c0_9] : memref<16x8xbf16, #tpu.memory_space<vmem>>, vector<16x8xbf16>
    %cst_10 = arith.constant dense<0.000000e+00> : vector<16x256xf32>
    %17 = tpu.matmul %16, %15, %cst_10 {dimension_numbers = #tpu.dot_dimension_numbers<[1], [0], [0], [1], [0, 0, 1, 1], [], []>} : vector<16x8xbf16>, vector<8x256xbf16>, vector<16x256xf32> -> vector<16x256xf32>
    %c0_11 = arith.constant 0 : index
    %c0_12 = arith.constant 0 : index
    %18 = vector.load %arg7[%c0_11, %c0_12] : memref<16x1xf32, #tpu.memory_space<vmem>>, vector<16x1xf32>
    %19 = vector.broadcast %18 : vector<16x1xf32> to vector<16x256xf32>
    %20 = arith.addf %17, %19 : vector<16x256xf32>
    %21 = vector.extract_strided_slice %9 {offsets = [8, 0], sizes = [8, 256], strides = [1, 1]} : vector<24x256xf32> to vector<8x256xf32>
    %22 = vector.extract_strided_slice %20 {offsets = [0, 0], sizes = [8, 256], strides = [1, 1]} : vector<16x256xf32> to vector<8x256xf32>
    %23 = arith.addf %21, %22 : vector<8x256xf32>
    %24 = vector.extract_strided_slice %20 {offsets = [8, 0], sizes = [8, 256], strides = [1, 1]} : vector<16x256xf32> to vector<8x256xf32>
    %25 = arith.addf %11, %24 : vector<8x256xf32>
    %cst_13 = arith.constant 0.000000e+00 : f32
    %26 = vector.broadcast %cst_13 : f32 to vector<8x256xf32>
    %27 = arith.maximumf %23, %26 : vector<8x256xf32>
    %28 = arith.truncf %27 : vector<8x256xf32> to vector<8x256xbf16>
    %c0_14 = arith.constant 0 : index
    %c0_15 = arith.constant 0 : index
    %29 = vector.load %arg5[%c0_14, %c0_15] : memref<8x8xbf16, #tpu.memory_space<vmem>>, vector<8x8xbf16>
    %cst_16 = arith.constant dense<0.000000e+00> : vector<8x256xf32>
    %30 = tpu.matmul %29, %28, %cst_16 {dimension_numbers = #tpu.dot_dimension_numbers<[1], [0], [0], [1], [0, 0, 1, 1], [], []>} : vector<8x8xbf16>, vector<8x256xbf16>, vector<8x256xf32> -> vector<8x256xf32>
    %c0_17 = arith.constant 0 : index
    %c0_18 = arith.constant 0 : index
    %31 = vector.load %arg8[%c0_17, %c0_18] : memref<8x1xf32, #tpu.memory_space<vmem>>, vector<8x1xf32>
    %32 = vector.broadcast %31 : vector<8x1xf32> to vector<8x256xf32>
    %33 = arith.addf %30, %32 : vector<8x256xf32>
    %34 = arith.addf %25, %33 : vector<8x256xf32>
    %c0_19 = arith.constant 0 : index
    %c0_20 = arith.constant 0 : index
    %c0_21 = arith.constant 0 : index
    %35 = vector.load %arg9[%c0_19, %c0_20, %c0_21] : memref<1x8x256xf32, #tpu.memory_space<vmem>>, vector<1x8x256xf32>
    %36 = vector.shape_cast %35 : vector<1x8x256xf32> to vector<8x256xf32>
    %37 = vector.shape_cast %34 : vector<8x256xf32> to vector<1x8x256xf32>
    tpu.vector_store %arg9[%c0_19, %c0_20, %c0_21], %37 {strides = array<i32>} : memref<1x8x256xf32, #tpu.memory_space<vmem>>, vector<1x8x256xf32>,
    return
  }
  func.func @transform_0(%arg0: i32, %arg1: i32) -> (i32, i32, i32) {
    %c0_i32 = arith.constant 0 : i32
    %c0_i32_0 = arith.constant 0 : i32
    return %arg0, %c0_i32, %arg1 : i32, i32, i32
  }
  func.func @transform_1(%arg0: i32, %arg1: i32) -> (i32, i32) {
    %c0_i32 = arith.constant 0 : i32
    %c0_i32_0 = arith.constant 0 : i32
    %c0_i32_1 = arith.constant 0 : i32
    return %c0_i32, %c0_i32_0 : i32, i32
  }
  func.func @transform_2(%arg0: i32, %arg1: i32) -> (i32, i32) {
    %c0_i32 = arith.constant 0 : i32
    %c0_i32_0 = arith.constant 0 : i32
    %c0_i32_1 = arith.constant 0 : i32
    return %c0_i32, %c0_i32_0 : i32, i32
  }
  func.func @transform_3(%arg0: i32, %arg1: i32) -> (i32, i32) {
    %c0_i32 = arith.constant 0 : i32
    %c0_i32_0 = arith.constant 0 : i32
    %c0_i32_1 = arith.constant 0 : i32
    return %c0_i32, %c0_i32_0 : i32, i32
  }
  func.func @transform_4(%arg0: i32, %arg1: i32) -> (i32, i32) {
    %c0_i32 = arith.constant 0 : i32
    %c0_i32_0 = arith.constant 0 : i32
    %c0_i32_1 = arith.constant 0 : i32
    return %c0_i32, %c0_i32_0 : i32, i32
  }
  func.func @transform_5(%arg0: i32, %arg1: i32) -> (i32, i32) {
    %c0_i32 = arith.constant 0 : i32
    %c0_i32_0 = arith.constant 0 : i32
    %c0_i32_1 = arith.constant 0 : i32
    return %c0_i32, %c0_i32_0 : i32, i32
  }
  func.func @transform_6(%arg0: i32, %arg1: i32) -> (i32, i32) {
    %c0_i32 = arith.constant 0 : i32
    %c0_i32_0 = arith.constant 0 : i32
    %c0_i32_1 = arith.constant 0 : i32
    return %c0_i32, %c0_i32_0 : i32, i32
  }
  func.func @transform_7(%arg0: i32, %arg1: i32) -> (i32, i32, i32) {
    %c0_i32 = arith.constant 0 : i32
    %c0_i32_0 = arith.constant 0 : i32
    return %arg0, %c0_i32, %arg1 : i32, i32, i32
  }
}

</mosaic_0001>

<bundles_post_ra>
// kernel: tpu_custom_call.1
= control target key start
LH: loop header
LB: loop body
LE: loop exit
PB: predicated region body
PF: predicated region fallthrough
CT: control target
= control target key end

     0   :  { %12 = vsyncpa [#allocation3], 0  ;;  %s967_s0 = inlined_call_operand.vmem [shape: f32[2,8,256], index: 0, kind: input, shape index: {}]   ;;  %s968_s1 = inlined_call_operand.vmem [shape: bf16[24,8], index: 1, kind: input, shape index: {}]   ;;  %s969_s2 = inlined_call_operand.vmem [shape: bf16[16,8], index: 2, kind: input, shape index: {}]   ;;  %s970_s3 = inlined_call_operand.vmem [shape: bf16[8,8], index: 3, kind: input, shape index: {}]   ;;  %s971_s4 = inlined_call_operand.vmem [shape: f32[24,1], index: 4, kind: input, shape index: {}]   ;;  %s972_s5 = inlined_call_operand.vmem [shape: f32[16,1], index: 5, kind: input, shape index: {}]   ;;  %s973_s6 = inlined_call_operand.vmem [shape: f32[8,1], index: 6, kind: input, shape index: {}]   ;;  %s974_s7 = inlined_call_operand.hbm [shape: f32[2,8,256], index: 7, kind: output, shape index: {}]  }
   0x1   :  { %14 = vsyncpa [#allocation3 + $0x1], 0  ;;  %s818_s24 = smov 0   ;;  %s820_s25 = smov 0  }
   0x2   :  { %s822_s26 = smov 0   ;;  %s824_s27 = smov 0  }
   0x3   :  { %s826_s28 = smov 0   ;;  %s828_s29 = smov 0  }
   0x4 LB: > { %s605_s30 = sadd.s32 4294967295, %s775_s29   ;;  %s606_s8 = sadd.s32 4294967294, %s775_s29   ;;  %s775_s29 = sphi %s828_s29, %s20_s29   ;;  %s771_s28 = sphi %s826_s28, %s981_s28   ;;  %s767_s27 = sphi %s824_s27, %s980_s27   ;;  %s763_s26 = sphi %s822_s26, %s979_s26   ;;  %s759_s25 = sphi %s820_s25, %s978_s25   ;;  %s755_s24 = sphi %s818_s24, %s977_s24  }
   0x5   : > { %s32_s9 = sadd.s32 1, %s771_s28  ;;  %s195_s10 = sadd.s32 1, %s763_s26 }
   0x6   : > { %p34_p0 = scmp.ge.s32.totalorder %s32_s9, 2  ;;  %p205_p1 = scmp.ne.s32.totalorder %s763_s26, %s759_s25 }
   0x7   : > { %p206_p2 = scmp.eq.s32.totalorder %s605_s30, 1  ;;  %p211_p3 = scmp.ne.s32.totalorder %s759_s25, %s755_s24 }
   0x8   : > { %s983_s9 = smov (%p34_p0, %s32_s9), 0  ;;  %p212_p5 = scmp.eq.s32.totalorder %s606_s8, 1 }
   0x9   : > { %p858_p4 = por %p206_p2, %p205_p1  ;;  %s190_s12 = ssub.s32 %s771_s28, %s983_s9 }
   0xa   : > { %p609_p6 = scmp.ge.s32.totalorder %s775_s29, 1  ;;  %p193_p7 = scmp.eq.s32.totalorder %s190_s12, 0 }
   0xb   : > { %p865_p8 = por %p212_p5, %p211_p3  ;;  %p261_p9 = scmp.lt.s32.totalorder %s775_s29, 3 }
   0xc   : > { %s871_s14 = scalar_select %p193_p7, %s763_s26, %s195_s10  }
   0xd   : > { %p262_p10 = pnand %p609_p6, %p261_p9 }
   0xe   : > { %p298_p11 = scmp.lt.s32.totalorder (!%p262_p10), %s767_s27, 1  ;;  %s294_s12 = sand.u32 (!%p262_p10), 1, %s759_s25  }
   0xf   : > { %265 = sbr.rel (%p262_p10) target bundleno = 454 (0x1c6), region = 48  ;;  %s610_s15 = sshll.u32 (!%p262_p10), %s294_s12, 4 }
  0x10   : > { %s637_s16 = sshll.u32 (!%p262_p10), %s767_s27, 4  ;;  %s296_s20 = scalar_lea.vmem (!%p262_p10), [#allocation2], %s610_s15 }
  0x11   : > { %s524_s19 = scalar_lea.hbm (!%p262_p10), %s974_s7, %s637_s16  ;;  %s511_s22 = scalar_lea.sflag (!%p262_p10), [#allocation3], %s294_s12 }
  0x12   : > { %s717_s15 = scalar_lea.hbm (!%p262_p10), %s974_s7, 32 }
  0x14   : > { %v318_v0 = vld [vmem:[%s971_s4] sm:$0xff]  ;;  %v777_v1 = vmov 0   ;;  %s299_s17 = scalar_select %p298_p11, %s767_s27, 1  ;;  %v319_v6 = vld [vmem:[%s971_s4 + $0x8] sm:$0xff]  ;;  %vm351_vm0 = vcmask 1043456   ;;  %vm344_vm1 = vcmask 64512  }
  0x15   : > { %694 = vset.pattern.permute.xlu0 %v777_v1  ;;  %695 = vset.pattern.permute.xlu1 %v777_v1  ;;  %v635_v11 = vld [vmem:[%s968_s1] sm:$0xff]  ;;  %v317_v12 = vld [vmem:[%s968_s1 + $0x8] sm:$0xf]  ;;  %v320_v17 = vld [vmem:[%s971_s4 + $0x10] sm:$0xff]  ;;  %s526_s27 = sshll.u32 %s296_s20, 4  ;;  %s527_s27 = int_to_ptr.vmem [resolvable:$true] %s526_s27 }
  0x16   : > { %323 = vperm.xlu0 %694, %v318_v0   ;;  %696 = vset.pattern.permute.xlu2 %v777_v1  ;;  %s634_s18 = sshll.u32 %s299_s17, 4  ;;  %v402_v13 = vld [vmem:[%s972_s5] sm:$0xff]  ;;  %v341_v14 = vunpack.c.l.b16 %v317_v12  ;;  %v403_v15 = vld [vmem:[%s972_s5 + $0x8] sm:$0xff] }
  0x17   : > { %s305_s21 = scalar_lea.vmem %s967_s0, %s634_s18  ;;  %406 = vperm.xlu1 %695, %v402_v13   ;;  %411 = vperm.xlu2 %696, %v403_v15   ;;  %v636_v29 = vld [vmem:[%s969_s2] sm:$0xff] }
  0x18   : > { %v881_v2 = vld [vmem:[%s305_s21] sm:$0xff]  ;;  %v883_v3 = vld [vmem:[%s305_s21 + $0x8] sm:$0xff]  ;;  %v343_v16 = vpack.c.b16 %v341_v14, %v341_v14  ;;  %s528_s21 = sshll.u32 %s524_s19, 4  ;;  %s529_s21 = int_to_ptr.hbm [resolvable:$true] %s528_s21 }
  0x19   : > { %v311_v4 = vmax.f32 %v881_v2, 0.0  ;;  %v312_v5 = vmax.f32 %v883_v3, 0.0  ;;  %v465_v36 = vld [vmem:[%s973_s6] sm:$0xff]  ;;  %s711_s23 = sshra.s32 %s529_s21, 4  ;;  %s712_s23 = int_to_ptr.hbm [resolvable:$true] %s711_s23 }
  0x1a   : > { %v464_v53 = vld [vmem:[%s970_s3] sm:$0xf]  ;;  %s713_s30 = scalar_lea.hbm %s712_s23, 16  ;;  %p718_p1 = scmp.lt.s32.totalorder %s712_s23, %s974_s7 }
  0x1b   : > { %v313_v7 = vpack.c.bf16 %v311_v4, %v311_v4  ;;  %v314_v8 = vpack.c.bf16 %v312_v5, %v312_v5  ;;  %p714_p12 = scmp.ne.s32.totalorder %s712_s23, %s713_s30  ;;  %p719_p2 = scmp.lt.s32.totalorder %s717_s15, %s713_s30 }
  0x1d   : > { %v353_v9 = vsel %vm351_vm0, %v313_v7, 0  ;;  %v356_v10 = vsel %vm351_vm0, %v314_v8, 0  ;;  %p715_p13 = pnand %p714_p12, %p858_p4  ;;  %p720_p3 = por %p719_p2, %p718_p1 }
  0x1e   : > { %328 = vperm.xlu0 %694, %v319_v6   ;;  %365 = vmatpush.bf16.msra.mxu0 %v353_v9 }
  0x1f   : > { %383 = vmatpush.bf16.msra.mxu1 %v356_v10  ;;  %333 = vperm.xlu1 %695, %v320_v17   ;;  %p716_p0 = pneg %p715_p13 }
  0x20   : > { %468 = vperm.xlu2 %696, %v465_v36  }
  0x21   : > { %617 = vmatmul.msk.bf16.vlgmr.msra.gmra.mxu0 %vm344_vm1, %v635_v11  ;;  %p721_p5 = pnand %p720_p3, %p716_p0 }
  0x22   : > { %619 = vmatmul.msk.bf16.vlgmr.msra.gmra.mxu1 %vm344_vm1, %v635_v11 }
  0x31   : > { %618 = vmatmul.msk.bf16.gmra.mxu0 %vm344_vm1, %v343_v16 }
  0x32   : > { %620 = vmatmul.msk.bf16.gmra.mxu1 %vm344_vm1, %v343_v16 }
  0x71   : > { %v412_v55 = vpop.permute.xlu2 %411 }
  0x7a   : > { %v469_v0 = vpop.permute.xlu2 %468 }
  0x88   : > { %v324_v18 = vpop.permute.xlu0 %323 }
  0x89   : > { %v407_v38 = vpop.permute.xlu1 %406 }
  0x90   : > { %v329_v37 = vpop.permute.xlu0 %328 }
  0x91   : > { %v334_v54 = vpop.permute.xlu1 %333 }
  0x9e   : > { %v367_v19 = vpop.f32.mrf.mxu0 }
  0x9f   : > { %v385_v20 = vpop.f32.mrf.mxu1  ;;  %v368_v21 = vadd.f32 %v367_v19, %v324_v18 }
  0xa0   : > { %v386_v22 = vadd.f32 %v385_v20, %v324_v18 }
  0xa1   : > { %v396_v23 = vmax.f32 %v368_v21, 0.0 }
  0xa2   : > { %v397_v24 = vmax.f32 %v386_v22, 0.0 }
  0xa3   : > { %v398_v25 = vpack.c.bf16 %v396_v23, %v396_v23 }
  0xa4   : > { %v399_v26 = vpack.c.bf16 %v397_v24, %v397_v24 }
  0xa5   : > { %v423_v27 = vsel %vm351_vm0, %v398_v25, 0 }
  0xa6   : > { %v426_v28 = vsel %vm351_vm0, %v399_v26, 0  ;;  %435 = vmatpush.bf16.msra.mxu2 %v423_v27  ;;  %v369_v30 = vpop.f32.mrf.mxu0 }
  0xa7   : > { %449 = vmatpush.bf16.msra.mxu3 %v426_v28  ;;  %v387_v31 = vpop.f32.mrf.mxu1  ;;  %v370_v41 = vadd.f32 %v369_v30, %v329_v37 }
  0xa8   : > { %v388_v42 = vadd.f32 %v387_v31, %v329_v37 }
  0xa9   : > { %625 = vmatmul.msk.bf16.vlgmr.msra.gmra.mxu2 %vm344_vm1, %v636_v29 }
  0xaa   : > { %626 = vmatmul.msk.bf16.vlgmr.msra.gmra.mxu3 %vm344_vm1, %v636_v29 }
  0xae   : > { %v372_v32 = vpop.f32.mrf.mxu0 }
  0xaf   : > { %v390_v33 = vpop.f32.mrf.mxu1  ;;  %v373_v58 = vadd.f32 %v372_v32, %v334_v54 }
  0xb0   : > { %v391_v59 = vadd.f32 %v390_v33, %v334_v54 }
  0xb1   : > { %v394_v62 = vadd.f32 %v373_v58, %v881_v2 }
  0xb2   : > { %v395_v63 = vadd.f32 %v391_v59, %v883_v3 }
  0xb6   : > { %v374_v34 = vpop.f32.mrf.mxu0 }
  0xb7   : > { %v392_v35 = vpop.f32.mrf.mxu1 }
 0x12c   : > { %v437_v39 = vpop.f32.mrf.mxu2 }
 0x12d   : > { %v451_v40 = vpop.f32.mrf.mxu3  ;;  %v438_v43 = vadd.f32 %v437_v39, %v407_v38 }
 0x12e   : > { %v452_v44 = vadd.f32 %v451_v40, %v407_v38 }
 0x12f   : > { %v456_v45 = vadd.f32 %v438_v43, %v370_v41 }
 0x130   : > { %v457_v46 = vadd.f32 %v452_v44, %v388_v42 }
 0x131   : > { %v460_v47 = vmax.f32 %v456_v45, 0.0 }
 0x132   : > { %v461_v48 = vmax.f32 %v457_v46, 0.0 }
 0x133   : > { %v462_v49 = vpack.c.bf16 %v460_v47, %v460_v47 }
 0x134   : > { %v463_v50 = vpack.c.bf16 %v461_v48, %v461_v48  ;;  %v439_v56 = vpop.f32.mrf.mxu2 }
 0x135   : > { %v475_v51 = vsel %vm351_vm0, %v462_v49, 0  ;;  %v453_v57 = vpop.f32.mrf.mxu3  ;;  %v440_v60 = vadd.f32 %v439_v56, %v412_v55 }
 0x136   : > { %v478_v52 = vsel %vm351_vm0, %v463_v50, 0  ;;  %487 = vmatpush.bf16.msrb.mxu2 %v475_v51  ;;  %v454_v61 = vadd.f32 %v453_v57, %v412_v55 }
 0x137   : > { %500 = vmatpush.bf16.msrb.mxu3 %v478_v52  ;;  %v458_v5 = vadd.f32 %v440_v60, %v394_v62 }
 0x138   : > { %v459_v6 = vadd.f32 %v454_v61, %v395_v63 }
 0x139   : > { %627 = vmatmul.msk.bf16.vlgmr.msrb.gmra.mxu2 %vm344_vm1, %v464_v53 }
 0x13a   : > { %628 = vmatmul.msk.bf16.vlgmr.msrb.gmra.mxu3 %vm344_vm1, %v464_v53 }
 0x1bc   : > { %v489_v1 = vpop.f32.mrf.mxu2 }
 0x1bd   : > { %v502_v4 = vpop.f32.mrf.mxu3  ;;  %v490_v7 = vadd.f32 %v489_v1, %v469_v0 }
 0x1be   : > { %v503_v8 = vadd.f32 %v502_v4, %v469_v0 }
 0x1bf   : > { %v506_v9 = vadd.f32 %v490_v7, %v458_v5 }
 0x1c0   : > { %v507_v10 = vadd.f32 %v503_v8, %v459_v6 }
 0x1c1   : > { %508 = vst [vmem:[%s296_s20] sm:$0xff] %v506_v9 }
 0x1c2   : > { %509 = vst [vmem:[%s296_s20 + $0x8] sm:$0xff] %v507_v10 }
 0x1c3   : > { %724 = shalt.err (!%p721_p5)
}
 0x1c4   : > { %638 = dma.vmem_to_hbm [thread:$0]  (%p858_p4), %s527_s27, 256, %s529_s21, %s511_s22   ;;  %v491_v2 = vpop.f32.mrf.mxu2 }
 0x1c5   : > { %v504_v3 = vpop.f32.mrf.mxu3 }
 0x1c6 PF: > { %p644_p6 = scmp.ge.s32.totalorder %s775_s29, 2  ;;  %s540_s12 = sand.u32 1, %s755_s24  }
 0x1c7   : > { %s541_s18 = scalar_lea.sflag [#allocation3], %s540_s12 }
 0x1c8   : > { %p641_p7 = pnand %p644_p6, %p865_p8 }
 0x1ca   : > { %p642_p9 = pneg %p641_p7 }
 0x1cc   : > { %750 = dma.done.wait (%p642_p9), %s541_s18, 256  }
 0x1cd   : > { %752 = vsyncadd (%p642_p9), %s541_s18, 4294967040  ;;  %s20_s29 = sadd.s32 1, %s775_s29   ;;  %s977_s24 = smov %s759_s25 }
 0x1ce   : > { %p17_p10 = scmp.ge.s32.totalorder %s20_s29, 4   ;;  %s978_s25 = smov %s763_s26 }
 0x1cf   : > { %s979_s26 = smov %s871_s14  ;;  %s980_s27 = smov %s771_s28 }
 0x1d0   : > { %s981_s28 = smov %s983_s9  ;;  %19 = sbr.rel (!%p17_p10) target bundleno = 4 (0x4), region = 83 }
 0x1d5   :  { %547 = vsyncpa [#allocation3], 1 }
 0x1d6   :  { %549 = vsyncpa [#allocation3 + $0x1], 1 }

// kernel: tpu_custom_call.1
= control target key start
LH: loop header
LB: loop body
LE: loop exit
PB: predicated region body
PF: predicated region fallthrough
CT: control target
= control target key end

     0   :  { %12 = vsyncpa [#allocation3], 0  ;;  %s967_s0 = inlined_call_operand.vmem [shape: f32[2,8,256], index: 0, kind: input, shape index: {}]   ;;  %s968_s1 = inlined_call_operand.vmem [shape: bf16[24,8], index: 1, kind: input, shape index: {}]   ;;  %s969_s2 = inlined_call_operand.vmem [shape: bf16[16,8], index: 2, kind: input, shape index: {}]   ;;  %s970_s3 = inlined_call_operand.vmem [shape: bf16[8,8], index: 3, kind: input, shape index: {}]   ;;  %s971_s4 = inlined_call_operand.vmem [shape: f32[24,1], index: 4, kind: input, shape index: {}]   ;;  %s972_s5 = inlined_call_operand.vmem [shape: f32[16,1], index: 5, kind: input, shape index: {}]   ;;  %s973_s6 = inlined_call_operand.vmem [shape: f32[8,1], index: 6, kind: input, shape index: {}]   ;;  %s974_s7 = inlined_call_operand.hbm [shape: f32[2,8,256], index: 7, kind: output, shape index: {}]  }
   0x1   :  { %14 = vsyncpa [#allocation3 + $0x1], 0  ;;  %s818_s24 = smov 0   ;;  %s820_s25 = smov 0  }
   0x2   :  { %s822_s26 = smov 0   ;;  %s824_s27 = smov 0  }
   0x3   :  { %s826_s28 = smov 0   ;;  %s828_s29 = smov 0  }
   0x4 LB: > { %s605_s30 = sadd.s32 4294967295, %s775_s29   ;;  %s606_s8 = sadd.s32 4294967294, %s775_s29   ;;  %s775_s29 = sphi %s828_s29, %s20_s29   ;;  %s771_s28 = sphi %s826_s28, %s981_s28   ;;  %s767_s27 = sphi %s824_s27, %s980_s27   ;;  %s763_s26 = sphi %s822_s26, %s979_s26   ;;  %s759_s25 = sphi %s820_s25, %s978_s25   ;;  %s755_s24 = sphi %s818_s24, %s977_s24  }
   0x5   : > { %s32_s9 = sadd.s32 1, %s771_s28  ;;  %s195_s10 = sadd.s32 1, %s763_s26 }
   0x6   : > { %p34_p0 = scmp.ge.s32.totalorder %s32_s9, 2  ;;  %p205_p1 = scmp.ne.s32.totalorder %s763_s26, %s759_s25 }
   0x7   : > { %p206_p2 = scmp.eq.s32.totalorder %s605_s30, 1  ;;  %p211_p3 = scmp.ne.s32.totalorder %s759_s25, %s755_s24 }
   0x8   : > { %s983_s9 = smov (%p34_p0, %s32_s9), 0  ;;  %p212_p5 = scmp.eq.s32.totalorder %s606_s8, 1 }
   0x9   : > { %p858_p4 = por %p206_p2, %p205_p1  ;;  %s190_s12 = ssub.s32 %s771_s28, %s983_s9 }
   0xa   : > { %p609_p6 = scmp.ge.s32.totalorder %s775_s29, 1  ;;  %p193_p7 = scmp.eq.s32.totalorder %s190_s12, 0 }
   0xb   : > { %p865_p8 = por %p212_p5, %p211_p3  ;;  %p261_p9 = scmp.lt.s32.totalorder %s775_s29, 3 }
   0xc   : > { %s871_s14 = scalar_select %p193_p7, %s763_s26, %s195_s10  }
   0xd   : > { %p262_p10 = pnand %p609_p6, %p261_p9 }
   0xe   : > { %p298_p11 = scmp.lt.s32.totalorder (!%p262_p10), %s767_s27, 1  ;;  %s294_s12 = sand.u32 (!%p262_p10), 1, %s759_s25  }
   0xf   : > { %265 = sbr.rel (%p262_p10) target bundleno = 454 (0x1c6), region = 48  ;;  %s610_s15 = sshll.u32 (!%p262_p10), %s294_s12, 4 }
  0x10   : > { %s637_s16 = sshll.u32 (!%p262_p10), %s767_s27, 4  ;;  %s296_s20 = scalar_lea.vmem (!%p262_p10), [#allocation2], %s610_s15 }
  0x11   : > { %s524_s19 = scalar_lea.hbm (!%p262_p10), %s974_s7, %s637_s16  ;;  %s511_s22 = scalar_lea.sflag (!%p262_p10), [#allocation3], %s294_s12 }
  0x12   : > { %s717_s15 = scalar_lea.hbm (!%p262_p10), %s974_s7, 32 }
  0x14   : > { %v318_v0 = vld [vmem:[%s971_s4] sm:$0xff]  ;;  %v777_v1 = vmov 0   ;;  %s299_s17 = scalar_select %p298_p11, %s767_s27, 1  ;;  %v319_v6 = vld [vmem:[%s971_s4 + $0x8] sm:$0xff]  ;;  %vm351_vm0 = vcmask 1043456   ;;  %vm344_vm1 = vcmask 64512  }
  0x15   : > { %694 = vset.pattern.permute.xlu0 %v777_v1  ;;  %695 = vset.pattern.permute.xlu1 %v777_v1  ;;  %v635_v11 = vld [vmem:[%s968_s1] sm:$0xff]  ;;  %v317_v12 = vld [vmem:[%s968_s1 + $0x8] sm:$0xf]  ;;  %v320_v17 = vld [vmem:[%s971_s4 + $0x10] sm:$0xff]  ;;  %s526_s27 = sshll.u32 %s296_s20, 4  ;;  %s527_s27 = int_to_ptr.vmem [resolvable:$true] %s526_s27 }
  0x16   : > { %323 = vperm.xlu0 %694, %v318_v0   ;;  %696 = vset.pattern.permute.xlu2 %v777_v1  ;;  %s634_s18 = sshll.u32 %s299_s17, 4  ;;  %v402_v13 = vld [vmem:[%s972_s5] sm:$0xff]  ;;  %v341_v14 = vunpack.c.l.b16 %v317_v12  ;;  %v403_v15 = vld [vmem:[%s972_s5 + $0x8] sm:$0xff] }
  0x17   : > { %s305_s21 = scalar_lea.vmem %s967_s0, %s634_s18  ;;  %406 = vperm.xlu1 %695, %v402_v13   ;;  %411 = vperm.xlu2 %696, %v403_v15   ;;  %v636_v29 = vld [vmem:[%s969_s2] sm:$0xff] }
  0x18   : > { %v881_v2 = vld [vmem:[%s305_s21] sm:$0xff]  ;;  %v883_v3 = vld [vmem:[%s305_s21 + $0x8] sm:$0xff]  ;;  %v343_v16 = vpack.c.b16 %v341_v14, %v341_v14  ;;  %s528_s21 = sshll.u32 %s524_s19, 4  ;;  %s529_s21 = int_to_ptr.hbm [resolvable:$true] %s528_s21 }
  0x19   : > { %v311_v4 = vmax.f32 %v881_v2, 0.0  ;;  %v312_v5 = vmax.f32 %v883_v3, 0.0  ;;  %v465_v36 = vld [vmem:[%s973_s6] sm:$0xff]  ;;  %s711_s23 = sshra.s32 %s529_s21, 4  ;;  %s712_s23 = int_to_ptr.hbm [resolvable:$true] %s711_s23 }
  0x1a   : > { %v464_v53 = vld [vmem:[%s970_s3] sm:$0xf]  ;;  %s713_s30 = scalar_lea.hbm %s712_s23, 16  ;;  %p718_p1 = scmp.lt.s32.totalorder %s712_s23, %s974_s7 }
  0x1b   : > { %v313_v7 = vpack.c.bf16 %v311_v4, %v311_v4  ;;  %v314_v8 = vpack.c.bf16 %v312_v5, %v312_v5  ;;  %p714_p12 = scmp.ne.s32.totalorder %s712_s23, %s713_s30  ;;  %p719_p2 = scmp.lt.s32.totalorder %s717_s15, %s713_s30 }
  0x1d   : > { %v353_v9 = vsel %vm351_vm0, %v313_v7, 0  ;;  %v356_v10 = vsel %vm351_vm0, %v314_v8, 0  ;;  %p715_p13 = pnand %p714_p12, %p858_p4  ;;  %p720_p3 = por %p719_p2, %p718_p1 }
  0x1e   : > { %328 = vperm.xlu0 %694, %v319_v6   ;;  %365 = vmatpush.bf16.msra.mxu0 %v353_v9 }
  0x1f   : > { %383 = vmatpush.bf16.msra.mxu1 %v356_v10  ;;  %333 = vperm.xlu1 %695, %v320_v17   ;;  %p716_p0 = pneg %p715_p13 }
  0x20   : > { %468 = vperm.xlu2 %696, %v465_v36  }
  0x21   : > { %617 = vmatmul.msk.bf16.vlgmr.msra.gmra.mxu0 %vm344_vm1, %v635_v11  ;;  %p721_p5 = pnand %p720_p3, %p716_p0 }
  0x22   : > { %619 = vmatmul.msk.bf16.vlgmr.msra.gmra.mxu1 %vm344_vm1, %v635_v11 }
  0x31   : > { %618 = vmatmul.msk.bf16.gmra.mxu0 %vm344_vm1, %v343_v16 }
  0x32   : > { %620 = vmatmul.msk.bf16.gmra.mxu1 %vm344_vm1, %v343_v16 }
  0x71   : > { %v412_v55 = vpop.permute.xlu2 %411 }
  0x7a   : > { %v469_v0 = vpop.permute.xlu2 %468 }
  0x88   : > { %v324_v18 = vpop.permute.xlu0 %323 }
  0x89   : > { %v407_v38 = vpop.permute.xlu1 %406 }
  0x90   : > { %v329_v37 = vpop.permute.xlu0 %328 }
  0x91   : > { %v334_v54 = vpop.permute.xlu1 %333 }
  0x9e   : > { %v367_v19 = vpop.f32.mrf.mxu0 }
  0x9f   : > { %v385_v20 = vpop.f32.mrf.mxu1  ;;  %v368_v21 = vadd.f32 %v367_v19, %v324_v18 }
  0xa0   : > { %v386_v22 = vadd.f32 %v385_v20, %v324_v18 }
  0xa1   : > { %v396_v23 = vmax.f32 %v368_v21, 0.0 }
  0xa2   : > { %v397_v24 = vmax.f32 %v386_v22, 0.0 }
  0xa3   : > { %v398_v25 = vpack.c.bf16 %v396_v23, %v396_v23 }
  0xa4   : > { %v399_v26 = vpack.c.bf16 %v397_v24, %v397_v24 }
  0xa5   : > { %v423_v27 = vsel %vm351_vm0, %v398_v25, 0 }
  0xa6   : > { %v426_v28 = vsel %vm351_vm0, %v399_v26, 0  ;;  %435 = vmatpush.bf16.msra.mxu2 %v423_v27  ;;  %v369_v30 = vpop.f32.mrf.mxu0 }
  0xa7   : > { %449 = vmatpush.bf16.msra.mxu3 %v426_v28  ;;  %v387_v31 = vpop.f32.mrf.mxu1  ;;  %v370_v41 = vadd.f32 %v369_v30, %v329_v37 }
  0xa8   : > { %v388_v42 = vadd.f32 %v387_v31, %v329_v37 }
  0xa9   : > { %625 = vmatmul.msk.bf16.vlgmr.msra.gmra.mxu2 %vm344_vm1, %v636_v29 }
  0xaa   : > { %626 = vmatmul.msk.bf16.vlgmr.msra.gmra.mxu3 %vm344_vm1, %v636_v29 }
  0xae   : > { %v372_v32 = vpop.f32.mrf.mxu0 }
  0xaf   : > { %v390_v33 = vpop.f32.mrf.mxu1  ;;  %v373_v58 = vadd.f32 %v372_v32, %v334_v54 }
  0xb0   : > { %v391_v59 = vadd.f32 %v390_v33, %v334_v54 }
  0xb1   : > { %v394_v62 = vadd.f32 %v373_v58, %v881_v2 }
  0xb2   : > { %v395_v63 = vadd.f32 %v391_v59, %v883_v3 }
  0xb6   : > { %v374_v34 = vpop.f32.mrf.mxu0 }
  0xb7   : > { %v392_v35 = vpop.f32.mrf.mxu1 }
 0x12c   : > { %v437_v39 = vpop.f32.mrf.mxu2 }
 0x12d   : > { %v451_v40 = vpop.f32.mrf.mxu3  ;;  %v438_v43 = vadd.f32 %v437_v39, %v407_v38 }
 0x12e   : > { %v452_v44 = vadd.f32 %v451_v40, %v407_v38 }
 0x12f   : > { %v456_v45 = vadd.f32 %v438_v43, %v370_v41 }
 0x130   : > { %v457_v46 = vadd.f32 %v452_v44, %v388_v42 }
 0x131   : > { %v460_v47 = vmax.f32 %v456_v45, 0.0 }
 0x132   : > { %v461_v48 = vmax.f32 %v457_v46, 0.0 }
 0x133   : > { %v462_v49 = vpack.c.bf16 %v460_v47, %v460_v47 }
 0x134   : > { %v463_v50 = vpack.c.bf16 %v461_v48, %v461_v48  ;;  %v439_v56 = vpop.f32.mrf.mxu2 }
 0x135   : > { %v475_v51 = vsel %vm351_vm0, %v462_v49, 0  ;;  %v453_v57 = vpop.f32.mrf.mxu3  ;;  %v440_v60 = vadd.f32 %v439_v56, %v412_v55 }
 0x136   : > { %v478_v52 = vsel %vm351_vm0, %v463_v50, 0  ;;  %487 = vmatpush.bf16.msrb.mxu2 %v475_v51  ;;  %v454_v61 = vadd.f32 %v453_v57, %v412_v55 }
 0x137   : > { %500 = vmatpush.bf16.msrb.mxu3 %v478_v52  ;;  %v458_v5 = vadd.f32 %v440_v60, %v394_v62 }
 0x138   : > { %v459_v6 = vadd.f32 %v454_v61, %v395_v63 }
 0x139   : > { %627 = vmatmul.msk.bf16.vlgmr.msrb.gmra.mxu2 %vm344_vm1, %v464_v53 }
 0x13a   : > { %628 = vmatmul.msk.bf16.vlgmr.msrb.gmra.mxu3 %vm344_vm1, %v464_v53 }
 0x1bc   : > { %v489_v1 = vpop.f32.mrf.mxu2 }
 0x1bd   : > { %v502_v4 = vpop.f32.mrf.mxu3  ;;  %v490_v7 = vadd.f32 %v489_v1, %v469_v0 }
 0x1be   : > { %v503_v8 = vadd.f32 %v502_v4, %v469_v0 }
 0x1bf   : > { %v506_v9 = vadd.f32 %v490_v7, %v458_v5 }
 0x1c0   : > { %v507_v10 = vadd.f32 %v503_v8, %v459_v6 }
 0x1c1   : > { %508 = vst [vmem:[%s296_s20] sm:$0xff] %v506_v9 }
 0x1c2   : > { %509 = vst [vmem:[%s296_s20 + $0x8] sm:$0xff] %v507_v10 }
 0x1c3   : > { %724 = shalt.err (!%p721_p5)
}
 0x1c4   : > { %638 = dma.vmem_to_hbm [thread:$0]  (%p858_p4), %s527_s27, 256, %s529_s21, %s511_s22   ;;  %v491_v2 = vpop.f32.mrf.mxu2 }
 0x1c5   : > { %v504_v3 = vpop.f32.mrf.mxu3 }
 0x1c6 PF: > { %p644_p6 = scmp.ge.s32.totalorder %s775_s29, 2  ;;  %s540_s12 = sand.u32 1, %s755_s24  }
 0x1c7   : > { %s541_s18 = scalar_lea.sflag [#allocation3], %s540_s12 }
 0x1c8   : > { %p641_p7 = pnand %p644_p6, %p865_p8 }
 0x1ca   : > { %p642_p9 = pneg %p641_p7 }
 0x1cc   : > { %750 = dma.done.wait (%p642_p9), %s541_s18, 256  }
 0x1cd   : > { %752 = vsyncadd (%p642_p9), %s541_s18, 4294967040  ;;  %s20_s29 = sadd.s32 1, %s775_s29   ;;  %s977_s24 = smov %s759_s25 }
 0x1ce   : > { %p17_p10 = scmp.ge.s32.totalorder %s20_s29, 4   ;;  %s978_s25 = smov %s763_s26 }
 0x1cf   : > { %s979_s26 = smov %s871_s14  ;;  %s980_s27 = smov %s771_s28 }
 0x1d0   : > { %s981_s28 = smov %s983_s9  ;;  %19 = sbr.rel (!%p17_p10) target bundleno = 4 (0x4), region = 83 }
 0x1d5   :  { %547 = vsyncpa [#allocation3], 1 }
 0x1d6   :  { %549 = vsyncpa [#allocation3 + $0x1], 1 }

</bundles_post_ra>
